<compile_context>
chip_gen: v5e
topology: v5e:2x2
jax: 0.10.0
libtpu: 0.0.40
codegen_flags: <defaults>
</compile_context>

<pallas_src>
import jax
import jax.numpy as jnp
from jax.experimental import pallas as pl
from jax.experimental.pallas import tpu as pltpu

N_EMBD = 32
NUM_HEADS = 4
HEAD_DIM = N_EMBD // NUM_HEADS
BLOCK_SIZE = 8   # T
BATCH = 2
LN_EPS = 1e-5
NEG_INF = -1e30  # large finite negative (avoids NaN from exp(-inf) on fully-masked rows)


def _layernorm(x, gamma, beta):
    # PyTorch nn.LayerNorm: biased variance, eps inside sqrt.
    mu = jnp.mean(x, axis=-1, keepdims=True)
    var = jnp.mean((x - mu) ** 2, axis=-1, keepdims=True)
    return (x - mu) * jax.lax.rsqrt(var + LN_EPS) * gamma + beta


def encoder_layer_kernel(x_ref, mask_ref, wqkv_ref, wo_ref, wf1_ref, wf2_ref,
                         pvec_ref, out_ref):
    S = x_ref.shape[0]            # B*T
    C, H, D = N_EMBD, NUM_HEADS, HEAD_DIM

    x = x_ref[...]                # (S, C) f32
    mask_add = mask_ref[...]      # (S, S) additive mask (0 / -1e30)

    pv = pvec_ref[...]            # (8, 128) packed parameter slab (f32)
    g1, b1 = pv[0:1, :C], pv[1:2, :C]
    g2, b2 = pv[2:3, :C], pv[3:4, :C]
    bo, bf2 = pv[4:5, :C], pv[5:6, :C]
    bf1 = pv[6:7, :4 * C]

    # ---- LN1 ----
    h = _layernorm(x, g1, b1)

    # ---- fused QKV projection (C**-0.5 scale pre-folded into Wq columns) ----
    qkv = jnp.dot(h.astype(jnp.bfloat16), wqkv_ref[...],
                  preferred_element_type=jnp.float32)            # (S, 3C) f32

    # Head-major relayout: (S, 3C) -> three (H, S, D) tensors via static lane
    # slices stacked along a new leading (major) axis.
    def split_heads(off):
        return jnp.stack(
            [qkv[:, off + hh * D: off + (hh + 1) * D] for hh in range(H)], axis=0)

    q = split_heads(0)            # (H, S, D)
    k = split_heads(C)
    v = split_heads(2 * C)

    # ---- multi-head self-attention (batched over the leading head axis) ----
    wei = jnp.einsum('hqd,hkd->hqk', q, k,
                     preferred_element_type=jnp.float32)         # (H, S, S)
    wei = wei + mask_add[None, :, :]   # pad-key mask + cross-batch block-diag mask
    wei = wei - jnp.max(wei, axis=-1, keepdims=True)
    p = jnp.exp(wei)
    p = p * pl.reciprocal(jnp.sum(p, axis=-1, keepdims=True), approx=True)
    # attention-weight dropout: identity in eval

    att = jnp.einsum('hqk,hkd->hqd', p, v,
                     preferred_element_type=jnp.float32)         # (H, S, D)
    att = jnp.concatenate([att[hh] for hh in range(H)], axis=-1)  # (S, C)
    att = jnp.dot(att.astype(jnp.bfloat16), wo_ref[...],
                  preferred_element_type=jnp.float32) + bo
    # proj dropout: identity in eval

    x = x + att                                                   # residual 1

    # ---- LN2 + FFN ----
    h2 = _layernorm(x, g2, b2)
    f = jnp.dot(h2.astype(jnp.bfloat16), wf1_ref[...],
                preferred_element_type=jnp.float32) + bf1
    f = jnp.maximum(f, 0.0)                                       # ReLU
    f = jnp.dot(f.astype(jnp.bfloat16), wf2_ref[...],
                preferred_element_type=jnp.float32) + bf2
    # FFN dropout: identity in eval

    # Output kept (S, C): a lane-dense (S*C/128, 128) store would save a few masked
    # vst's but is skipped to avoid an in-kernel lane relayout for ~2 KB of output.
    out_ref[...] = (x + f).astype(out_ref.dtype)                  # residual 2


def prepare_encoder_inputs(params, pad_mask, batch, seq_len):
    """One-time packing of parameters + additive attention mask.

    Hoisted out of the per-call hot path: call once per (params, pad_mask), reuse
    the returned arrays for every jitted encoder_layer() call.
    """
    C = N_EMBD
    S = batch * seq_len

    # Reference scales scores by C**-0.5 with C = N_EMBD (x.shape[-1]); fold into Wq.
    scale = float(C) ** -0.5
    w_qkv = jnp.concatenate(
        [params["wq"] * scale, params["wk"], params["wv"]], axis=1)   # (C, 3C)

    # bf16 MXU operands (accumulation stays f32 inside the kernel).
    w_qkv = w_qkv.astype(jnp.bfloat16)
    wo = params["wo"].astype(jnp.bfloat16)
    wf1 = params["wf1"].astype(jnp.bfloat16)
    wf2 = params["wf2"].astype(jnp.bfloat16)

    # Pack the eight small vectors into a single (8,128) f32 tile:
    # rows 0..5 lanes 0:C -> g1,b1,g2,b2,bo,bf2 ; row 6 lanes 0:4C -> bf1.
    slab = jnp.zeros((8, 128), jnp.float32)
    for r, name in enumerate(["g1", "b1", "g2", "b2", "bo", "bf2"]):
        slab = slab.at[r, :C].set(params[name].reshape(C))
    slab = slab.at[6, :4 * C].set(params["bf1"].reshape(4 * C))

    # Additive attention mask over the flattened (B*T) sequence: a query may only
    # attend to keys of its own batch element (block-diagonal) that are not padded.
    batch_ids = jnp.repeat(jnp.arange(batch, dtype=jnp.int32), seq_len)   # (S,)
    same_batch = batch_ids[:, None] == batch_ids[None, :]                 # (S, S)
    key_keep = (pad_mask.reshape(S) > 0.5)[None, :]                       # (1, S)
    mask_add = jnp.where(same_batch & key_keep, 0.0, NEG_INF).astype(jnp.float32)

    return mask_add, w_qkv, wo, wf1, wf2, slab


@jax.jit
def encoder_layer(x, mask_add, w_qkv, wo, wf1, wf2, slab):
    """x: (B, T, C) f32; remaining args come from prepare_encoder_inputs()."""
    B, T, C = x.shape
    S = B * T
    vmem = pltpu.MemorySpace.VMEM

    out = pl.pallas_call(
        encoder_layer_kernel,
        out_shape=jax.ShapeDtypeStruct((S, C), x.dtype),
        # No grid: single invocation, whole arrays resident in VMEM, no pipeline
        # machinery / double buffers.
        in_specs=[pl.BlockSpec(memory_space=vmem)] * 7,
        out_specs=pl.BlockSpec(memory_space=vmem),
    )(x.reshape(S, C), mask_add, w_qkv, wo, wf1, wf2, slab)

    return out.reshape(B, T, C)


def encoder_layer_reference(x, pad_mask, params):
    """Pure-JAX f32 replica of the PyTorch EncoderLayer forward (eval mode)."""
    B, T, C = x.shape
    H, D = NUM_HEADS, HEAD_DIM

    def ln(v, g, b):
        mu = jnp.mean(v, axis=-1, keepdims=True)
        var = jnp.mean((v - mu) ** 2, axis=-1, keepdims=True)
        return (v - mu) / jnp.sqrt(var + LN_EPS) * g + b

    h = ln(x, params["g1"].reshape(C), params["b1"].reshape(C))
    outs = []
    for hh in range(H):
        wq = params["wq"][:, hh * D:(hh + 1) * D]
        wk = params["wk"][:, hh * D:(hh + 1) * D]
        wv = params["wv"][:, hh * D:(hh + 1) * D]
        q, k, v = h @ wq, h @ wk, h @ wv                         # (B, T, D)
        wei = jnp.einsum('btd,bsd->bts', q, k) * (float(C) ** -0.5)
        wei = jnp.where(pad_mask[:, None, :] > 0.5, wei, NEG_INF)
        wei = jax.nn.softmax(wei, axis=-1)
        outs.append(jnp.einsum('bts,bsd->btd', wei, v))
    att = jnp.concatenate(outs, axis=-1) @ params["wo"] + params["bo"].reshape(C)
    x = x + att
    h2 = ln(x, params["g2"].reshape(C), params["b2"].reshape(C))
    f = jnp.maximum(h2 @ params["wf1"] + params["bf1"].reshape(4 * C), 0.0)
    f = f @ params["wf2"] + params["bf2"].reshape(C)
    return x + f


def init_params(key):
    C = N_EMBD
    keys = jax.random.split(key, 10)
    s = 0.02
    # Per-head key/query/value weights are concatenated column-wise so that
    # (x @ W)[:, h*D:(h+1)*D] == head_h(x), matching torch.cat of head outputs.
    return {
        "wq": jax.random.normal(keys[0], (C, C), jnp.float32) * s,
        "wk": jax.random.normal(keys[1], (C, C), jnp.float32) * s,
        "wv": jax.random.normal(keys[2], (C, C), jnp.float32) * s,
        "wo": jax.random.normal(keys[3], (C, C), jnp.float32) * s,
        "bo": jax.random.normal(keys[4], (1, C), jnp.float32) * s,
        "g1": jnp.ones((1, C), jnp.float32),   # nn.LayerNorm default init
        "b1": jnp.zeros((1, C), jnp.float32),
        "g2": jnp.ones((1, C), jnp.float32),
        "b2": jnp.zeros((1, C), jnp.float32),
        "wf1": jax.random.normal(keys[5], (C, 4 * C), jnp.float32) * s,
        "bf1": jax.random.normal(keys[6], (1, 4 * C), jnp.float32) * s,
        "wf2": jax.random.normal(keys[7], (4 * C, C), jnp.float32) * s,
        "bf2": jax.random.normal(keys[8], (1, C), jnp.float32) * s,
    }


if __name__ == "__main__":
    key = jax.random.PRNGKey(0)
    kx, kp = jax.random.split(key)

    x = jax.random.normal(kx, (BATCH, BLOCK_SIZE, N_EMBD), jnp.float32)
    # pad_mask: 1 = valid token, 0 = padded key. Second sequence has 2 padded slots.
    pad_mask = jnp.ones((BATCH, BLOCK_SIZE), jnp.float32)
    pad_mask = pad_mask.at[1, -2:].set(0.0)

    params = init_params(kp)

    # One-time packing (hoisted out of the per-call hot path).
    packed = jax.block_until_ready(
        prepare_encoder_inputs(params, pad_mask, BATCH, BLOCK_SIZE))

    out = encoder_layer(x, *packed)
    jax.block_until_ready(out)

    assert out.shape == (BATCH, BLOCK_SIZE, N_EMBD)
    assert bool(jnp.all(jnp.isfinite(out)))

    # Loose tolerance: kernel uses bf16 MXU operands + approx softmax reciprocal;
    # residual path itself stays exact f32.
    ref = encoder_layer_reference(x, pad_mask, params)
    assert bool(jnp.allclose(out, ref, atol=5e-2, rtol=5e-2))

    print("KERNEL_OK")
</pallas_src>

<mosaic_0001>
module attributes {stable_mosaic.version = 11 : i64} {
  func.func @encoder_layer_kernel(%arg0: memref<16x32xf32, #tpu.memory_space<vmem>>, %arg1: memref<16x16xf32, #tpu.memory_space<vmem>>, %arg2: memref<32x96xbf16, #tpu.memory_space<vmem>>, %arg3: memref<32x32xbf16, #tpu.memory_space<vmem>>, %arg4: memref<32x128xbf16, #tpu.memory_space<vmem>>, %arg5: memref<128x32xbf16, #tpu.memory_space<vmem>>, %arg6: memref<8x128xf32, #tpu.memory_space<vmem>>, %arg7: memref<16x32xf32, #tpu.memory_space<vmem>>) attributes {dimension_semantics = [], scalar_prefetch = 0 : i64, scratch_operands = 0 : i64, tpu.core_type = #tpu.core_type<tc>} {
    %c0 = arith.constant 0 : index
    %c0_0 = arith.constant 0 : index
    %0 = vector.load %arg0[%c0, %c0_0] : memref<16x32xf32, #tpu.memory_space<vmem>>, vector<16x32xf32>
    %c0_1 = arith.constant 0 : index
    %c0_2 = arith.constant 0 : index
    %1 = vector.load %arg1[%c0_1, %c0_2] : memref<16x16xf32, #tpu.memory_space<vmem>>, vector<16x16xf32>
    %c0_3 = arith.constant 0 : index
    %c0_4 = arith.constant 0 : index
    %2 = vector.load %arg6[%c0_3, %c0_4] : memref<8x128xf32, #tpu.memory_space<vmem>>, vector<8x128xf32>
    %3 = vector.extract_strided_slice %2 {offsets = [0, 0], sizes = [1, 32], strides = [1, 1]} : vector<8x128xf32> to vector<1x32xf32>
    %4 = vector.extract_strided_slice %2 {offsets = [1, 0], sizes = [1, 32], strides = [1, 1]} : vector<8x128xf32> to vector<1x32xf32>
    %5 = vector.extract_strided_slice %2 {offsets = [2, 0], sizes = [1, 32], strides = [1, 1]} : vector<8x128xf32> to vector<1x32xf32>
    %6 = vector.extract_strided_slice %2 {offsets = [3, 0], sizes = [1, 32], strides = [1, 1]} : vector<8x128xf32> to vector<1x32xf32>
    %7 = vector.extract_strided_slice %2 {offsets = [4, 0], sizes = [1, 32], strides = [1, 1]} : vector<8x128xf32> to vector<1x32xf32>
    %8 = vector.extract_strided_slice %2 {offsets = [5, 0], sizes = [1, 32], strides = [1, 1]} : vector<8x128xf32> to vector<1x32xf32>
    %9 = vector.extract_strided_slice %2 {offsets = [6, 0], sizes = [1, 128], strides = [1, 1]} : vector<8x128xf32> to vector<1x128xf32>
    %cst = arith.constant dense<0.000000e+00> : vector<16xf32>
    %10 = vector.multi_reduction <add>, %0, %cst [1] : vector<16x32xf32> to vector<16xf32>
    %11 = vector.shape_cast %10 : vector<16xf32> to vector<16x1xf32>
    %cst_5 = arith.constant 3.200000e+01 : f32
    %12 = vector.broadcast %cst_5 : f32 to vector<16x1xf32>
    %13 = arith.divf %11, %12 : vector<16x1xf32>
    %14 = vector.broadcast %13 : vector<16x1xf32> to vector<16x32xf32>
    %15 = arith.subf %0, %14 : vector<16x32xf32>
    %16 = arith.mulf %15, %15 : vector<16x32xf32>
    %cst_6 = arith.constant dense<0.000000e+00> : vector<16xf32>
    %17 = vector.multi_reduction <add>, %16, %cst_6 [1] : vector<16x32xf32> to vector<16xf32>
    %18 = vector.shape_cast %17 : vector<16xf32> to vector<16x1xf32>
    %cst_7 = arith.constant 3.200000e+01 : f32
    %19 = vector.broadcast %cst_7 : f32 to vector<16x1xf32>
    %20 = arith.divf %18, %19 : vector<16x1xf32>
    %21 = vector.broadcast %13 : vector<16x1xf32> to vector<16x32xf32>
    %22 = arith.subf %0, %21 : vector<16x32xf32>
    %cst_8 = arith.constant 9.99999974E-6 : f32
    %23 = vector.broadcast %cst_8 : f32 to vector<16x1xf32>
    %24 = arith.addf %20, %23 : vector<16x1xf32>
    %25 = math.rsqrt %24 : vector<16x1xf32>
    %26 = vector.broadcast %25 : vector<16x1xf32> to vector<16x32xf32>
    %27 = arith.mulf %22, %26 : vector<16x32xf32>
    %28 = vector.broadcast %3 : vector<1x32xf32> to vector<16x32xf32>
    %29 = arith.mulf %27, %28 : vector<16x32xf32>
    %30 = vector.broadcast %4 : vector<1x32xf32> to vector<16x32xf32>
    %31 = arith.addf %29, %30 : vector<16x32xf32>
    %32 = arith.truncf %31 : vector<16x32xf32> to vector<16x32xbf16>
    %c0_9 = arith.constant 0 : index
    %c0_10 = arith.constant 0 : index
    %33 = vector.load %arg2[%c0_9, %c0_10] : memref<32x96xbf16, #tpu.memory_space<vmem>>, vector<32x96xbf16>
    %cst_11 = arith.constant dense<0.000000e+00> : vector<16x96xf32>
    %34 = tpu.matmul %32, %33, %cst_11 {dimension_numbers = #tpu.dot_dimension_numbers<[1], [0], [0], [1], [0, 0, 1, 1], [], []>} : vector<16x32xbf16>, vector<32x96xbf16>, vector<16x96xf32> -> vector<16x96xf32>
    %35 = vector.extract_strided_slice %34 {offsets = [0, 0], sizes = [16, 8], strides = [1, 1]} : vector<16x96xf32> to vector<16x8xf32>
    %36 = vector.extract_strided_slice %34 {offsets = [0, 8], sizes = [16, 8], strides = [1, 1]} : vector<16x96xf32> to vector<16x8xf32>
    %37 = vector.extract_strided_slice %34 {offsets = [0, 16], sizes = [16, 8], strides = [1, 1]} : vector<16x96xf32> to vector<16x8xf32>
    %38 = vector.extract_strided_slice %34 {offsets = [0, 24], sizes = [16, 8], strides = [1, 1]} : vector<16x96xf32> to vector<16x8xf32>
    %39 = vector.shape_cast %35 : vector<16x8xf32> to vector<1x16x8xf32>
    %40 = vector.shape_cast %36 : vector<16x8xf32> to vector<1x16x8xf32>
    %41 = vector.shape_cast %37 : vector<16x8xf32> to vector<1x16x8xf32>
    %42 = vector.shape_cast %38 : vector<16x8xf32> to vector<1x16x8xf32>
    %43 = tpu.concatenate %39, %40, %41, %42 in 0 : vector<1x16x8xf32>, vector<1x16x8xf32>, vector<1x16x8xf32>, vector<1x16x8xf32> -> vector<4x16x8xf32>
    %44 = vector.extract_strided_slice %34 {offsets = [0, 32], sizes = [16, 8], strides = [1, 1]} : vector<16x96xf32> to vector<16x8xf32>
    %45 = vector.extract_strided_slice %34 {offsets = [0, 40], sizes = [16, 8], strides = [1, 1]} : vector<16x96xf32> to vector<16x8xf32>
    %46 = vector.extract_strided_slice %34 {offsets = [0, 48], sizes = [16, 8], strides = [1, 1]} : vector<16x96xf32> to vector<16x8xf32>
    %47 = vector.extract_strided_slice %34 {offsets = [0, 56], sizes = [16, 8], strides = [1, 1]} : vector<16x96xf32> to vector<16x8xf32>
    %48 = vector.shape_cast %44 : vector<16x8xf32> to vector<1x16x8xf32>
    %49 = vector.shape_cast %45 : vector<16x8xf32> to vector<1x16x8xf32>
    %50 = vector.shape_cast %46 : vector<16x8xf32> to vector<1x16x8xf32>
    %51 = vector.shape_cast %47 : vector<16x8xf32> to vector<1x16x8xf32>
    %52 = tpu.concatenate %48, %49, %50, %51 in 0 : vector<1x16x8xf32>, vector<1x16x8xf32>, vector<1x16x8xf32>, vector<1x16x8xf32> -> vector<4x16x8xf32>
    %53 = vector.extract_strided_slice %34 {offsets = [0, 64], sizes = [16, 8], strides = [1, 1]} : vector<16x96xf32> to vector<16x8xf32>
    %54 = vector.extract_strided_slice %34 {offsets = [0, 72], sizes = [16, 8], strides = [1, 1]} : vector<16x96xf32> to vector<16x8xf32>
    %55 = vector.extract_strided_slice %34 {offsets = [0, 80], sizes = [16, 8], strides = [1, 1]} : vector<16x96xf32> to vector<16x8xf32>
    %56 = vector.extract_strided_slice %34 {offsets = [0, 88], sizes = [16, 8], strides = [1, 1]} : vector<16x96xf32> to vector<16x8xf32>
    %57 = vector.shape_cast %53 : vector<16x8xf32> to vector<1x16x8xf32>
    %58 = vector.shape_cast %54 : vector<16x8xf32> to vector<1x16x8xf32>
    %59 = vector.shape_cast %55 : vector<16x8xf32> to vector<1x16x8xf32>
    %60 = vector.shape_cast %56 : vector<16x8xf32> to vector<1x16x8xf32>
    %61 = tpu.concatenate %57, %58, %59, %60 in 0 : vector<1x16x8xf32>, vector<1x16x8xf32>, vector<1x16x8xf32>, vector<1x16x8xf32> -> vector<4x16x8xf32>
    "tpu.trace_start"() <{level = 10 : i32, message = "hqd,hkd->hqk"}> : () -> ()
    %cst_12 = arith.constant dense<0.000000e+00> : vector<4x16x16xf32>
    %62 = tpu.matmul %43, %52, %cst_12 {dimension_numbers = #tpu.dot_dimension_numbers<[2], [2], [1], [1], [0, 0, 0, 1, 1, 1], [0], [0]>} : vector<4x16x8xf32>, vector<4x16x8xf32>, vector<4x16x16xf32> -> vector<4x16x16xf32>
    "tpu.trace_stop"() : () -> ()
    %63 = vector.shape_cast %1 : vector<16x16xf32> to vector<1x16x16xf32>
    %64 = vector.broadcast %63 : vector<1x16x16xf32> to vector<4x16x16xf32>
    %65 = arith.addf %62, %64 : vector<4x16x16xf32>
    %cst_13 = arith.constant dense<0xFF800000> : vector<4x16xf32>
    %66 = vector.multi_reduction <maximumf>, %65, %cst_13 [2] : vector<4x16x16xf32> to vector<4x16xf32>
    %67 = vector.shape_cast %66 : vector<4x16xf32> to vector<4x16x1xf32>
    %68 = vector.broadcast %67 : vector<4x16x1xf32> to vector<4x16x16xf32>
    %69 = arith.subf %65, %68 : vector<4x16x16xf32>
    %70 = math.exp %69 : vector<4x16x16xf32>
    %cst_14 = arith.constant dense<0.000000e+00> : vector<4x16xf32>
    %71 = vector.multi_reduction <add>, %70, %cst_14 [2] : vector<4x16x16xf32> to vector<4x16xf32>
    %72 = vector.shape_cast %71 : vector<4x16xf32> to vector<4x16x1xf32>
    %73 = tpu.reciprocal %72 {approx = true} : vector<4x16x1xf32> -> vector<4x16x1xf32>
    %74 = vector.broadcast %73 : vector<4x16x1xf32> to vector<4x16x16xf32>
    %75 = arith.mulf %70, %74 : vector<4x16x16xf32>
    "tpu.trace_start"() <{level = 10 : i32, message = "hqk,hkd->hqd"}> : () -> ()
    %cst_15 = arith.constant dense<0.000000e+00> : vector<4x16x8xf32>
    %76 = tpu.matmul %75, %61, %cst_15 {dimension_numbers = #tpu.dot_dimension_numbers<[2], [1], [1], [2], [0, 0, 0, 1, 1, 2], [0], [0]>} : vector<4x16x16xf32>, vector<4x16x8xf32>, vector<4x16x8xf32> -> vector<4x16x8xf32>
    "tpu.trace_stop"() : () -> ()
    %77 = vector.extract_strided_slice %76 {offsets = [0, 0, 0], sizes = [1, 16, 8], strides = [1, 1, 1]} : vector<4x16x8xf32> to vector<1x16x8xf32>
    %78 = vector.shape_cast %77 : vector<1x16x8xf32> to vector<16x8xf32>
    %79 = vector.extract_strided_slice %76 {offsets = [1, 0, 0], sizes = [1, 16, 8], strides = [1, 1, 1]} : vector<4x16x8xf32> to vector<1x16x8xf32>
    %80 = vector.shape_cast %79 : vector<1x16x8xf32> to vector<16x8xf32>
    %81 = vector.extract_strided_slice %76 {offsets = [2, 0, 0], sizes = [1, 16, 8], strides = [1, 1, 1]} : vector<4x16x8xf32> to vector<1x16x8xf32>
    %82 = vector.shape_cast %81 : vector<1x16x8xf32> to vector<16x8xf32>
    %83 = vector.extract_strided_slice %76 {offsets = [3, 0, 0], sizes = [1, 16, 8], strides = [1, 1, 1]} : vector<4x16x8xf32> to vector<1x16x8xf32>
    %84 = vector.shape_cast %83 : vector<1x16x8xf32> to vector<16x8xf32>
    %85 = tpu.concatenate %78, %80, %82, %84 in 1 : vector<16x8xf32>, vector<16x8xf32>, vector<16x8xf32>, vector<16x8xf32> -> vector<16x32xf32>
    %86 = arith.truncf %85 : vector<16x32xf32> to vector<16x32xbf16>
    %c0_16 = arith.constant 0 : index
    %c0_17 = arith.constant 0 : index
    %87 = vector.load %arg3[%c0_16, %c0_17] : memref<32x32xbf16, #tpu.memory_space<vmem>>, vector<32x32xbf16>
    %cst_18 = arith.constant dense<0.000000e+00> : vector<16x32xf32>
    %88 = tpu.matmul %86, %87, %cst_18 {dimension_numbers = #tpu.dot_dimension_numbers<[1], [0], [0], [1], [0, 0, 1, 1], [], []>} : vector<16x32xbf16>, vector<32x32xbf16>, vector<16x32xf32> -> vector<16x32xf32>
    %89 = vector.broadcast %7 : vector<1x32xf32> to vector<16x32xf32>
    %90 = arith.addf %88, %89 : vector<16x32xf32>
    %91 = arith.addf %0, %90 : vector<16x32xf32>
    %cst_19 = arith.constant dense<0.000000e+00> : vector<16xf32>
    %92 = vector.multi_reduction <add>, %91, %cst_19 [1] : vector<16x32xf32> to vector<16xf32>
    %93 = vector.shape_cast %92 : vector<16xf32> to vector<16x1xf32>
    %cst_20 = arith.constant 3.200000e+01 : f32
    %94 = vector.broadcast %cst_20 : f32 to vector<16x1xf32>
    %95 = arith.divf %93, %94 : vector<16x1xf32>
    %96 = vector.broadcast %95 : vector<16x1xf32> to vector<16x32xf32>
    %97 = arith.subf %91, %96 : vector<16x32xf32>
    %98 = arith.mulf %97, %97 : vector<16x32xf32>
    %cst_21 = arith.constant dense<0.000000e+00> : vector<16xf32>
    %99 = vector.multi_reduction <add>, %98, %cst_21 [1] : vector<16x32xf32> to vector<16xf32>
    %100 = vector.shape_cast %99 : vector<16xf32> to vector<16x1xf32>
    %cst_22 = arith.constant 3.200000e+01 : f32
    %101 = vector.broadcast %cst_22 : f32 to vector<16x1xf32>
    %102 = arith.divf %100, %101 : vector<16x1xf32>
    %103 = vector.broadcast %95 : vector<16x1xf32> to vector<16x32xf32>
    %104 = arith.subf %91, %103 : vector<16x32xf32>
    %cst_23 = arith.constant 9.99999974E-6 : f32
    %105 = vector.broadcast %cst_23 : f32 to vector<16x1xf32>
    %106 = arith.addf %102, %105 : vector<16x1xf32>
    %107 = math.rsqrt %106 : vector<16x1xf32>
    %108 = vector.broadcast %107 : vector<16x1xf32> to vector<16x32xf32>
    %109 = arith.mulf %104, %108 : vector<16x32xf32>
    %110 = vector.broadcast %5 : vector<1x32xf32> to vector<16x32xf32>
    %111 = arith.mulf %109, %110 : vector<16x32xf32>
    %112 = vector.broadcast %6 : vector<1x32xf32> to vector<16x32xf32>
    %113 = arith.addf %111, %112 : vector<16x32xf32>
    %114 = arith.truncf %113 : vector<16x32xf32> to vector<16x32xbf16>
    %c0_24 = arith.constant 0 : index
    %c0_25 = arith.constant 0 : index
    %115 = vector.load %arg4[%c0_24, %c0_25] : memref<32x128xbf16, #tpu.memory_space<vmem>>, vector<32x128xbf16>
    %cst_26 = arith.constant dense<0.000000e+00> : vector<16x128xf32>
    %116 = tpu.matmul %114, %115, %cst_26 {dimension_numbers = #tpu.dot_dimension_numbers<[1], [0], [0], [1], [0, 0, 1, 1], [], []>} : vector<16x32xbf16>, vector<32x128xbf16>, vector<16x128xf32> -> vector<16x128xf32>
    %117 = vector.broadcast %9 : vector<1x128xf32> to vector<16x128xf32>
    %118 = arith.addf %116, %117 : vector<16x128xf32>
    %cst_27 = arith.constant 0.000000e+00 : f32
    %119 = vector.broadcast %cst_27 : f32 to vector<16x128xf32>
    %120 = arith.maximumf %118, %119 : vector<16x128xf32>
    %121 = arith.truncf %120 : vector<16x128xf32> to vector<16x128xbf16>
    %c0_28 = arith.constant 0 : index
    %c0_29 = arith.constant 0 : index
    %122 = vector.load %arg5[%c0_28, %c0_29] : memref<128x32xbf16, #tpu.memory_space<vmem>>, vector<128x32xbf16>
    %cst_30 = arith.constant dense<0.000000e+00> : vector<16x32xf32>
    %123 = tpu.matmul %121, %122, %cst_30 {dimension_numbers = #tpu.dot_dimension_numbers<[1], [0], [0], [1], [0, 0, 1, 1], [], []>} : vector<16x128xbf16>, vector<128x32xbf16>, vector<16x32xf32> -> vector<16x32xf32>
    %124 = vector.broadcast %8 : vector<1x32xf32> to vector<16x32xf32>
    %125 = arith.addf %123, %124 : vector<16x32xf32>
    %126 = arith.addf %91, %125 : vector<16x32xf32>
    %c0_31 = arith.constant 0 : index
    %c0_32 = arith.constant 0 : index
    %127 = vector.load %arg7[%c0_31, %c0_32] : memref<16x32xf32, #tpu.memory_space<vmem>>, vector<16x32xf32>
    tpu.vector_store %arg7[%c0_31, %c0_32], %126 {strides = array<i32>} : memref<16x32xf32, #tpu.memory_space<vmem>>, vector<16x32xf32>,
    return
  }
}

</mosaic_0001>

<bundles_post_ra>
// kernel: encoder_layer.1
= control target key start
LH: loop header
LB: loop body
LE: loop exit
PB: predicated region body
PF: predicated region fallthrough
CT: control target
= control target key end

     0   :  { %12 = vsyncpa [#allocation3], 0  ;;  %s1307_s0 = inlined_call_operand.vmem [shape: f32[16,32], index: 0, kind: input, shape index: {}]   ;;  %s1308_s1 = inlined_call_operand.vmem [shape: f32[16,16], index: 1, kind: input, shape index: {}]   ;;  %s1309_s2 = inlined_call_operand.vmem [shape: bf16[32,96], index: 2, kind: input, shape index: {}]   ;;  %s1310_s3 = inlined_call_operand.vmem [shape: bf16[32,32], index: 3, kind: input, shape index: {}]   ;;  %s1311_s4 = inlined_call_operand.vmem [shape: bf16[32,128], index: 4, kind: input, shape index: {}]   ;;  %s1312_s5 = inlined_call_operand.vmem [shape: bf16[128,32], index: 5, kind: input, shape index: {}]   ;;  %s1313_s6 = inlined_call_operand.hbm [shape: f32[8,128], index: 6, kind: input, shape index: {}]   ;;  %s1314_s7 = inlined_call_operand.hbm [shape: f32[16,32], index: 7, kind: output, shape index: {}]  }
   0x1   :  { %13 = vsyncpa [#allocation4], 0  ;;  %s31_s26 = sshll.u32 %s1313_s6, 4  ;;  %s1021_s27 = smov [#allocation2]   ;;  %s32_s26 = int_to_ptr.hbm [resolvable:$true] %s31_s26 }
   0x2   :  { %s33_s28 = sshll.u32 %s1021_s27, 4  ;;  %s34_s28 = int_to_ptr.vmem [resolvable:$true] %s33_s28 }
   0x3   :  { %36 = dma.hbm_to_vmem [thread:$0]  %s32_s26, 128, %s34_s28, [#allocation3]  }
   0x4   :  { %1017 = dma.done.wait [#allocation3], 128  }
   0x5   :  { %1018 = vsyncadd [#allocation3], 4294967168  ;;  %vm47_vm0 = vcmask 261120   ;;  %v1079_v0 = vld [vmem:[%s1307_s0] sm:$0xff]  ;;  %v1086_v2 = vld [vmem:[%s1307_s0 + $0x8] sm:$0xff]  ;;  %v1022_v4 = vmov 32.0  }
   0x6   :  { %v48_v1 = vsel %vm47_vm0, %v1079_v0, 0.0  ;;  %v51_v3 = vsel %vm47_vm0, %v1086_v2, 0.0  ;;  %927 = vrcp.f32 %v1022_v4  ;;  %v865_v21 = vld [vmem:[%s1309_s2 + $0x8] sm:$0xff]  ;;  %v864_v23 = vld [vmem:[%s1309_s2] sm:$0xff]  ;;  %s1023_s2 = smov 112   ;;  %s1024_s12 = smov 120  }
   0x7   :  { %49 = vadd.xlane.f32.xlu0 %v48_v1  ;;  %131 = vmatpush.bf16.msra.mxu0 %v865_v21  ;;  %v1106_v40 = vld [vmem:[#allocation2] sm:$0xff]  ;;  %s1025_s13 = smov 104   ;;  %s1026_s14 = smov 96   ;;  %vm157_vm8 = vcmask 64512   ;;  %vm294_vm9 = vcmask 130048   ;;  %vm551_vm10 = vcmask 195584  }
   0x8   :  { %v99_v43 = vperm.slane %v1106_v40, 0  ;;  %v102_v48 = vperm.slane %v1106_v40, 1  ;;  %s1028_s19 = smov 16   ;;  %s1029_s20 = smov 8  }
   0x9   :  { %s1030_s21 = smov 24   ;;  %s1032_s22 = smov 128  }
   0xb   :  { %132 = vmatpush.bf16.msra.mxu0 %v864_v23 }
   0xc   :  { %v928_v5 = vpop.eup %927 }
   0xd   :  { %v55_v6 = vmul.f32 32.0, %v928_v5  ;;  %vm59_vm1 = vweird.f32 %v928_v5 }
   0xf   :  { %52 = vadd.xlane.f32.xlu0 %v51_v3  ;;  %v56_v7 = vsub.f32 1.0, %v55_v6 }
  0x11   :  { %v57_v8 = vmul.f32 %v928_v5, %v56_v7  ;;  %v44_v7 = vld [vmem:[%s1308_s1] sm:$0xff] }
  0x13   :  { %v58_v9 = vadd.f32 %v928_v5, %v57_v8 }
  0x15   :  { %v1090_v10 = vsel %vm59_vm1, %v928_v5, %v58_v9 }
  0x7a   :  { %v50_v11 = vpop.xlane.xlu0 %49 }
  0x7b   :  { %v61_v12 = vmul.f32 %v1090_v10, %v50_v11 }
  0x7d   :  { %v63_v13 = vsub.f32 %v1079_v0, %v61_v12  ;;  %v45_v12 = vld [vmem:[%s1308_s1 + $0x8] sm:$0xff]  ;;  %s1027_s1 = smov 64  }
  0x7f   :  { %v65_v14 = vmul.f32 %v63_v13, %v63_v13 }
  0x81   :  { %v67_v15 = vsel %vm47_vm0, %v65_v14, 0.0 }
  0x82   :  { %68 = vadd.xlane.f32.xlu1 %v67_v15  ;;  %v53_v16 = vpop.xlane.xlu0 %52 }
  0x83   :  { %v62_v17 = vmul.f32 %v1090_v10, %v53_v16 }
  0x85   :  { %v64_v18 = vsub.f32 %v1086_v2, %v62_v17 }
  0x87   :  { %v66_v19 = vmul.f32 %v64_v18, %v64_v18 }
  0x89   :  { %v70_v20 = vsel %vm47_vm0, %v66_v19, 0.0 }
  0x8a   :  { %71 = vadd.xlane.f32.xlu1 %v70_v20 }
  0xf5   :  { %v69_v22 = vpop.xlane.xlu1 %68 }
  0xf6   :  { %v73_v24 = vmul.f32 %v69_v22, %v1090_v10 }
  0xf8   :  { %v75_v25 = vadd.f32 1e-05, %v73_v24 }
  0xfa   :  { %929 = vrsqrt.f32 %v75_v25  ;;  %vm83_vm3 = vweird.f32 %v75_v25 }
  0xfd   :  { %v72_v26 = vpop.xlane.xlu1 %71 }
  0xfe   :  { %v74_v27 = vmul.f32 %v72_v26, %v1090_v10 }
 0x100   :  { %v930_v28 = vpop.eup %929  ;;  %v76_v29 = vadd.f32 1e-05, %v74_v27 }
 0x101   :  { %v78_v30 = vmul.f32 %v930_v28, %v75_v25  ;;  %vm84_vm2 = vweird.f32 %v930_v28 }
 0x102   :  { %931 = vrsqrt.f32 %v76_v29  ;;  %vm85_vm4 = vmor %vm83_vm3, %vm84_vm2  ;;  %vm93_vm6 = vweird.f32 %v76_v29 }
 0x103   :  { %v79_v31 = vmul.f32 %v930_v28, %v78_v30 }
 0x105   :  { %v80_v32 = vmul.f32 0.5, %v79_v31 }
 0x107   :  { %v81_v33 = vsub.f32 1.5, %v80_v32 }
 0x108   :  { %v932_v34 = vpop.eup %931 }
 0x109   :  { %v82_v35 = vmul.f32 %v930_v28, %v81_v33  ;;  %v88_v36 = vmul.f32 %v932_v34, %v76_v29  ;;  %vm94_vm5 = vweird.f32 %v932_v34 }
 0x10a   :  { %vm95_vm7 = vmor %vm93_vm6, %vm94_vm5 }
 0x10b   :  { %v89_v37 = vmul.f32 %v932_v34, %v88_v36  ;;  %v86_v38 = vsel %vm85_vm4, %v930_v28, %v82_v35 }
 0x10c   :  { %v97_v42 = vmul.f32 %v86_v38, %v63_v13 }
 0x10d   :  { %v90_v39 = vmul.f32 0.5, %v89_v37 }
 0x10e   :  { %v100_v47 = vmul.f32 %v99_v43, %v97_v42 }
 0x10f   :  { %v91_v41 = vsub.f32 1.5, %v90_v39 }
 0x110   :  { %v103_v50 = vadd.f32 %v102_v48, %v100_v47 }
 0x111   :  { %v92_v44 = vmul.f32 %v932_v34, %v91_v41 }
 0x113   :  { %v96_v45 = vsel %vm95_vm7, %v932_v34, %v92_v44 }
 0x114   :  { %v98_v46 = vmul.f32 %v96_v45, %v64_v18 }
 0x116   :  { %v101_v49 = vmul.f32 %v99_v43, %v98_v46 }
 0x118   :  { %v104_v51 = vadd.f32 %v102_v48, %v101_v49 }
 0x11a   :  { %v105_v52 = vpack.c.bf16 %v104_v51, %v103_v50 }
 0x11c   :  { %789 = vmatmul.msk.bf16.vlgmr.msra.gmra.mxu0 %vm47_vm0, %v105_v52 }
 0x199   :  { %v1111_v53 = vpop.f32.mrf.mxu0 }
 0x19a   :  { %145 = vrot.lane.b32.xlu1 %v1111_v53, %s1023_s2 }
 0x1a1   :  { %v1114_v54 = vpop.f32.mrf.mxu0 }
 0x1a2   :  { %147 = vrot.lane.b32.xlu0 %v1114_v54, %s1023_s2  ;;  %143 = vrot.lane.b32.xlu2 %v1114_v54, %s1024_s12 }
 0x1aa   :  { %141 = vrot.lane.b32.xlu2 %v1111_v53, %s1024_s12 }
 0x1b2   :  { %151 = vrot.lane.b32.xlu2 %v1114_v54, %s1025_s13 }
 0x1ba   :  { %149 = vrot.lane.b32.xlu2 %v1111_v53, %s1025_s13 }
 0x1fc   :  { %v1121_v55 = vpop.permute.xlu2 %143 }
 0x1fd   :  { %191 = vrot.lane.b32.xlu2 %v1121_v55, %s1026_s14 }
 0x204   :  { %v1124_v56 = vpop.permute.xlu2 %141 }
 0x205   :  { %189 = vrot.lane.b32.xlu0 %v1124_v56, %s1026_s14 }
 0x20c   :  { %v1127_v57 = vpop.permute.xlu1 %145  ;;  %v1129_v58 = vpop.permute.xlu2 %151 }
 0x20d   :  { %224 = vrot.lane.b32.xlu1 %v1127_v57, %s1026_s14  ;;  %261 = vrot.lane.b32.xlu0 %v1129_v58, %s1026_s14 }
 0x214   :  { %v1133_v59 = vpop.permute.xlu0 %147  ;;  %v1138_v60 = vpop.permute.xlu2 %149 }
 0x215   :  { %155 = vrot.lane.b32.xlu1 %v1114_v54, %s1026_s14  ;;  %226 = vrot.lane.b32.xlu2 %v1133_v59, %s1026_s14 }
 0x216   :  { %153 = vrot.lane.b32.xlu0 %v1111_v53, %s1026_s14 }
 0x21d   :  { %259 = vrot.lane.b32.xlu2 %v1138_v60, %s1026_s14 }
 0x257   :  { %v192_v61 = vpop.permute.xlu2 %191 }
 0x258   :  { %794 = vmatpush.xpose.msk.msra.mxu2 %vm157_vm8, %v192_v61 }
 0x26f   :  { %v227_v62 = vpop.permute.xlu2 %226 }
 0x270   :  { %798 = vmatpush.xpose.msk.msrb.mxu0 %vm157_vm8, %v227_v62  ;;  %878 = vmatpush.xpose.msk.msra.mxu3 %vm157_vm8, %v227_v62  ;;  %v902_v62 = vpack.i.bf16 %v1138_v60, %v1129_v58 }
 0x277   :  { %v190_v63 = vpop.permute.xlu0 %189  ;;  %v260_v4 = vpop.permute.xlu2 %259 }
 0x278   :  { %795 = vmatpush.xpose.msk.msra.mxu2 %vm157_vm8, %v190_v63 }
 0x27b   :  { %796 = vmatmul.msk.f32.vlgmr.msra.gmra.mxu2 %vm157_vm8, %v1124_v56 }
 0x27f   :  { %v225_v1 = vpop.permute.xlu1 %224  ;;  %v262_v3 = vpop.permute.xlu0 %261 }
 0x280   :  { %799 = vmatpush.xpose.msk.msrb.mxu0 %vm157_vm8, %v225_v1  ;;  %879 = vmatpush.xpose.msk.msra.mxu3 %vm157_vm8, %v225_v1 }
 0x283   :  { %797 = vmatmul.msk.f32.gmra.mxu2 %vm157_vm8, %v1121_v55  ;;  %800 = vmatmul.msk.f32.vlgmr.msrb.gmra.mxu0 %vm157_vm8, %v1127_v57 }
 0x284   :  { %802 = vmatpush.xpose.msk.msra.mxu0 %vm157_vm8, %v262_v3  ;;  %801 = vmatmul.msk.f32.vlgmr.msra.gmra.mxu3 %vm157_vm8, %v1133_v59 }
 0x287   :  { %v156_v5 = vpop.permute.xlu1 %155 }
 0x288   :  { %803 = vmatpush.xpose.msk.msra.mxu0 %vm157_vm8, %v260_v4  ;;  %790 = vmatpush.xpose.msk.msra.mxu1 %vm157_vm8, %v156_v5  ;;  %v154_v6 = vpop.permute.xlu0 %153  ;;  %v892_v4 = vpack.i.bf16 %v1133_v59, %v1121_v55 }
 0x28b   :  { %804 = vmatmul.msk.f32.vlgmr.msra.gmra.mxu0 %vm157_vm8, %v1138_v60 }
 0x28c   :  { %791 = vmatpush.xpose.msk.msra.mxu1 %vm157_vm8, %v154_v6  ;;  %v897_v6 = vpack.i.bf16 %v1127_v57, %v1124_v56  ;;  %v907_v57 = vpack.i.bf16 %v1111_v53, %v1114_v54 }
 0x28f   :  { %792 = vmatmul.msk.f32.vlgmr.msra.gmra.mxu1 %vm157_vm8, %v1111_v53 }
 0x293   :  { %805 = vmatmul.msk.f32.gmra.mxu0 %vm157_vm8, %v1129_v58 }
 0x297   :  { %793 = vmatmul.msk.f32.gmra.mxu1 %vm157_vm8, %v1114_v54 }
 0x2fe   :  { %v218_v18 = vpop.f32.mrf.mxu2 }
 0x2ff   :  { %v219_v20 = vadd.f32 %v218_v18, %v44_v7 }
 0x300   :  { %v253_v8 = vpop.f32.mrf.mxu0 }
 0x301   :  { %v254_v9 = vadd.f32 %v253_v8, %v44_v7  ;;  %v301_v25 = vsel %vm294_vm9, %v219_v20, -inf }
 0x303   :  { %v307_v11 = vsel %vm294_vm9, %v254_v9, -inf }
 0x304   :  { %308 = vmax.xlane.f32.xlu1 %v307_v11 }
 0x306   :  { %v221_v26 = vpop.f32.mrf.mxu2 }
 0x307   :  { %v256_v13 = vpop.f32.mrf.mxu3  ;;  %v222_v27 = vadd.f32 %v221_v26, %v45_v12 }
 0x308   :  { %v257_v14 = vadd.f32 %v256_v13, %v45_v12  ;;  %v288_v23 = vpop.f32.mrf.mxu0 }
 0x309   :  { %v289_v28 = vadd.f32 %v288_v23, %v44_v7  ;;  %v304_v29 = vsel %vm294_vm9, %v222_v27, -inf }
 0x30a   :  { %v310_v15 = vsel %vm294_vm9, %v257_v14, -inf }
 0x30b   :  { %v313_v30 = vsel %vm294_vm9, %v289_v28, -inf }
 0x30c   :  { %v183_v16 = vpop.f32.mrf.mxu1  ;;  %311 = vmax.xlane.f32.xlu1 %v310_v15 }
 0x30d   :  { %v1175_v17 = vadd.f32 %v183_v16, %v44_v7 }
 0x30f   :  { %v295_v19 = vsel %vm294_vm9, %v1175_v17, -inf }
 0x310   :  { %296 = vmax.xlane.f32.xlu2 %v295_v19  ;;  %v291_v31 = vpop.f32.mrf.mxu0 }
 0x311   :  { %v292_v32 = vadd.f32 %v291_v31, %v45_v12 }
 0x313   :  { %v316_v33 = vsel %vm294_vm9, %v292_v32, -inf }
 0x314   :  { %v186_v21 = vpop.f32.mrf.mxu1 }
 0x315   :  { %v1179_v22 = vadd.f32 %v186_v21, %v45_v12 }
 0x317   :  { %v298_v24 = vsel %vm294_vm9, %v1179_v22, -inf }
 0x318   :  { %299 = vmax.xlane.f32.xlu0 %v298_v24  ;;  %302 = vmax.xlane.f32.xlu2 %v301_v25 }
 0x320   :  { %305 = vmax.xlane.f32.xlu0 %v304_v29  ;;  %314 = vmax.xlane.f32.xlu2 %v313_v30 }
 0x328   :  { %317 = vmax.xlane.f32.xlu0 %v316_v33 }
 0x377   :  { %v309_v34 = vpop.xlane.xlu1 %308 }
 0x378   :  { %v323_v35 = vsub.f32 %v254_v9, %v309_v34 }
 0x37a   :  { %v335_v36 = vmul.f32 1.442695, %v323_v35 }
 0x37c   :  { %933 = vpow2.f32 %v335_v36 }
 0x37f   :  { %v312_v37 = vpop.xlane.xlu1 %311 }
 0x380   :  { %v324_v38 = vsub.f32 %v257_v14, %v312_v37 }
 0x382   :  { %v1187_v39 = vpop.eup %933  ;;  %v337_v41 = vmul.f32 1.442695, %v324_v38 }
 0x383   :  { %v297_v42 = vpop.xlane.xlu2 %296  ;;  %v355_v43 = vsel %vm294_vm9, %v1187_v39, 0.0 }
 0x384   :  { %935 = vpow2.f32 %v337_v41  ;;  %356 = vadd.xlane.f32.xlu2 %v355_v43  ;;  %v319_v13 = vsub.f32 %v1175_v17, %v297_v42 }
 0x386   :  { %v327_v55 = vmul.f32 1.442695, %v319_v13 }
 0x38a   :  { %v1191_v44 = vpop.eup %935 }
 0x38b   :  { %v303_v45 = vpop.xlane.xlu2 %302  ;;  %v358_v46 = vsel %vm294_vm9, %v1191_v44, 0.0  ;;  %v300_v3 = vpop.xlane.xlu0 %299 }
 0x38c   :  { %v321_v47 = vsub.f32 %v219_v20, %v303_v45  ;;  %359 = vadd.xlane.f32.xlu0 %v358_v46  ;;  %v320_v16 = vsub.f32 %v1179_v22, %v300_v3 }
 0x38e   :  { %v331_v48 = vmul.f32 1.442695, %v321_v47  ;;  %v329_v17 = vmul.f32 1.442695, %v320_v16 }
 0x390   :  { %937 = vpow2.f32 %v331_v48 }
 0x393   :  { %v315_v49 = vpop.xlane.xlu2 %314  ;;  %v306_v5 = vpop.xlane.xlu0 %305 }
 0x394   :  { %v325_v50 = vsub.f32 %v289_v28, %v315_v49  ;;  %v322_v7 = vsub.f32 %v222_v27, %v306_v5 }
 0x396   :  { %v339_v51 = vmul.f32 1.442695, %v325_v50  ;;  %v1195_v52 = vpop.eup %937  ;;  %v333_v8 = vmul.f32 1.442695, %v322_v7 }
 0x397   :  { %v349_v61 = vsel %vm294_vm9, %v1195_v52, 0.0 }
 0x398   :  { %939 = vpow2.f32 %v339_v51  ;;  %350 = vadd.xlane.f32.xlu1 %v349_v61 }
 0x399   :  { %941 = vpow2.f32 %v333_v8 }
 0x39b   :  { %v318_v60 = vpop.xlane.xlu0 %317 }
 0x39c   :  { %v326_v11 = vsub.f32 %v292_v32, %v318_v60  ;;  %v867_v60 = vld [vmem:[%s1310_s3 + $0x8] sm:$0xff] }
 0x39e   :  { %v940_v63 = vpop.eup %939  ;;  %v341_v12 = vmul.f32 1.442695, %v326_v11 }
 0x39f   :  { %v361_v1 = vsel %vm294_vm9, %v940_v63, 0.0  ;;  %v942_v58 = vpop.eup %941 }
 0x3a0   :  { %903 = vrot.lane.b32.xlu0 %v902_v62, %s1027_s1  ;;  %362 = vadd.xlane.f32.xlu2 %v361_v1  ;;  %v352_v9 = vsel %vm294_vm9, %v942_v58, 0.0  ;;  %943 = vpow2.f32 %v341_v12 }
 0x3a1   :  { %945 = vpow2.f32 %v327_v55 }
 0x3a2   :  { %947 = vpow2.f32 %v329_v17 }
 0x3a6   :  { %v1208_v59 = vpop.eup %943 }
 0x3a7   :  { %v364_v56 = vsel %vm294_vm9, %v1208_v59, 0.0  ;;  %v1214_v14 = vpop.eup %945 }
 0x3a8   :  { %v343_v15 = vsel %vm294_vm9, %v1214_v14, 0.0  ;;  %v948_v18 = vpop.eup %947 }
 0x3a9   :  { %v346_v19 = vsel %vm294_vm9, %v948_v18, 0.0 }
 0x3b1   :  { %893 = vrot.lane.b32.xlu1 %v892_v4, %s1027_s1 }
 0x3b8   :  { %898 = vrot.lane.b32.xlu2 %v897_v6, %s1027_s1 }
 0x3ca   :  { %353 = vadd.xlane.f32.xlu0 %v352_v9  ;;  %v866_v9 = vld [vmem:[%s1310_s3] sm:$0xff] }
 0x3db   :  { %365 = vadd.xlane.f32.xlu1 %v364_v56 }
 0x3de   :  { %908 = vrot.lane.b32.xlu0 %v907_v57, %s1027_s1 }
 0x3e1   :  { %344 = vadd.xlane.f32.xlu2 %v343_v15 }
 0x3f7   :  { %v357_v21 = vpop.xlane.xlu2 %356 }
 0x3ff   :  { %v360_v20 = vpop.xlane.xlu0 %359 }
 0x408   :  { %347 = vadd.xlane.f32.xlu0 %v346_v19 }
 0x40b   :  { %v351_v26 = vpop.xlane.xlu1 %350 }
 0x412   :  { %v904_v23 = vpop.permute.xlu0 %903 }
 0x413   :  { %v905_v24 = vunpack.i.l.bf16 %v904_v23  ;;  %v363_v53 = vpop.xlane.xlu2 %362  ;;  %v906_v54 = vunpack.i.h.bf16 %v904_v23 }
 0x414   :  { %949 = vrcp.f32 %v363_v53 }
 0x415   :  { %514 = vmatpush.msrb.mxu0 %v905_v24  ;;  %951 = vrcp.f32 %v357_v21 }
 0x416   :  { %953 = vrcp.f32 %v351_v26 }
 0x417   :  { %515 = vmatpush.msrb.mxu0 %v906_v54  ;;  %955 = vrcp.f32 %v360_v20  ;;  %v559_v54 = vperm.slane %v1106_v40, 4 }
 0x41a   :  { %v950_v25 = vpop.eup %949 }
 0x41b   :  { %v381_v27 = vmul.f32 %v950_v25, %v940_v63  ;;  %v952_v22 = vpop.eup %951  ;;  %v899_v28 = vpop.permute.xlu2 %898 }
 0x41c   :  { %v954_v30 = vpop.eup %953  ;;  %v900_v33 = vunpack.i.l.bf16 %v899_v28  ;;  %v901_v34 = vunpack.i.h.bf16 %v899_v28  ;;  %v379_v36 = vmul.f32 %v952_v22, %v1187_v39 }
 0x41d   :  { %812 = vmatmul.msk.f32.vlgmr.msrb.gmra.mxu0 %vm294_vm9, %v381_v27  ;;  %v377_v35 = vmul.f32 %v954_v30, %v1195_v52  ;;  %v956_v37 = vpop.eup %955 }
 0x41e   :  { %v380_v38 = vmul.f32 %v956_v37, %v1191_v44 }
 0x423   :  { %v894_v29 = vpop.permute.xlu1 %893 }
 0x424   :  { %v895_v31 = vunpack.i.l.bf16 %v894_v29  ;;  %v896_v32 = vunpack.i.h.bf16 %v894_v29 }
 0x426   :  { %444 = vmatpush.msrb.mxu2 %v895_v31  ;;  %479 = vmatpush.msrb.mxu3 %v896_v32 }
 0x428   :  { %445 = vmatpush.msrb.mxu2 %v900_v33  ;;  %480 = vmatpush.msrb.mxu3 %v901_v34 }
 0x429   :  { %808 = vmatmul.msk.f32.vlgmr.msrb.gmra.mxu2 %vm294_vm9, %v377_v35  ;;  %810 = vmatmul.msk.f32.vlgmr.msrb.gmra.mxu3 %vm294_vm9, %v379_v36 }
 0x431   :  { %811 = vmatmul.msk.f32.gmra.mxu3 %vm294_vm9, %v380_v38 }
 0x43d   :  { %v354_v41 = vpop.xlane.xlu0 %353 }
 0x43e   :  { %957 = vrcp.f32 %v354_v41 }
 0x444   :  { %v958_v42 = vpop.eup %957 }
 0x445   :  { %v378_v43 = vmul.f32 %v958_v42, %v942_v58  ;;  %v869_v42 = vld [vmem:[%s1311_s4 + $0x8] sm:$0xff] }
 0x446   :  { %668 = vmatpush.bf16.msra.mxu2 %v869_v42 }
 0x447   :  { %809 = vmatmul.msk.f32.gmra.mxu2 %vm294_vm9, %v378_v43 }
 0x44e   :  { %v366_v45 = vpop.xlane.xlu1 %365 }
 0x44f   :  { %959 = vrcp.f32 %v366_v45 }
 0x450   :  { %v909_v39 = vpop.permute.xlu0 %908 }
 0x451   :  { %v910_v46 = vunpack.i.l.bf16 %v909_v39  ;;  %v911_v47 = vunpack.i.h.bf16 %v909_v39  ;;  %v868_v39 = vld [vmem:[%s1311_s4] sm:$0xff] }
 0x452   :  { %669 = vmatpush.bf16.msra.mxu2 %v868_v39 }
 0x453   :  { %409 = vmatpush.msrb.mxu1 %v910_v46 }
 0x454   :  { %v345_v48 = vpop.xlane.xlu2 %344 }
 0x455   :  { %410 = vmatpush.msrb.mxu1 %v911_v47  ;;  %v960_v49 = vpop.eup %959  ;;  %961 = vrcp.f32 %v345_v48  ;;  %v877_v47 = vld [vmem:[%s1312_s5 + $0x38] sm:$0xff] }
 0x456   :  { %v382_v44 = vmul.f32 %v960_v49, %v1208_v59  ;;  %744 = vmatpush.bf16.msra.mxu3 %v877_v47 }
 0x457   :  { %581 = vmatpush.bf16.msra.mxu1 %v867_v60  ;;  %v635_v60 = vperm.slane %v1106_v40, 2 }
 0x458   :  { %813 = vmatmul.msk.f32.gmra.mxu0 %vm294_vm9, %v382_v44  ;;  %v876_v44 = vld [vmem:[%s1312_s5 + $0x30] sm:$0xff] }
 0x45a   :  { %745 = vmatpush.bf16.msra.mxu3 %v876_v44 }
 0x45b   :  { %v962_v50 = vpop.eup %961  ;;  %582 = vmatpush.bf16.msra.mxu1 %v866_v9 }
 0x45c   :  { %v375_v51 = vmul.f32 %v962_v50, %v1214_v14 }
 0x45e   :  { %806 = vmatmul.msk.f32.vlgmr.msrb.gmra.mxu1 %vm294_vm9, %v375_v51 }
 0x47b   :  { %v348_v52 = vpop.xlane.xlu0 %347 }
 0x47c   :  { %963 = vrcp.f32 %v348_v52 }
 0x482   :  { %v964_v61 = vpop.eup %963 }
 0x483   :  { %v376_v62 = vmul.f32 %v964_v61, %v948_v18  ;;  %v875_v61 = vld [vmem:[%s1312_s5 + $0x28] sm:$0xff] }
 0x484   :  { %746 = vmatpush.bf16.msra.mxu3 %v875_v61 }
 0x485   :  { %807 = vmatmul.msk.f32.gmra.mxu1 %vm294_vm9, %v376_v62 }
 0x49a   :  { %v517_v7 = vpop.f32.mrf.mxu0 }
 0x4ac   :  { %v482_v63 = vpop.f32.mrf.mxu3  ;;  %v447_v4 = vpop.f32.mrf.mxu2 }
 0x4b4   :  { %v485_v1 = vpop.f32.mrf.mxu3 }
 0x4b5   :  { %v917_v3 = vpack.i.bf16 %v485_v1, %v482_v63 }
 0x4b7   :  { %918 = vrot.lane.b32.xlu2 %v917_v3, %s1028_s19 }
 0x4ca   :  { %v450_v5 = vpop.f32.mrf.mxu2 }
 0x4cb   :  { %v912_v6 = vpack.i.bf16 %v450_v5, %v447_v4 }
 0x4cd   :  { %913 = vrot.lane.b32.xlu1 %v912_v6, %s1029_s20 }
 0x4d5   :  { %v520_v8 = vpop.f32.mrf.mxu0 }
 0x4d6   :  { %v922_v58 = vpack.i.bf16 %v520_v8, %v517_v7 }
 0x4d8   :  { %923 = vrot.lane.b32.xlu0 %v922_v58, %s1030_s21  ;;  %s768_s21 = sshll.u32 %s1314_s7, 4  ;;  %s769_s21 = int_to_ptr.hbm [resolvable:$true] %s768_s21 }
 0x4db   :  { %v412_v11 = vpop.f32.mrf.mxu1 }
 0x502   :  { %v415_v56 = vpop.f32.mrf.mxu1 }
 0x511   :  { %v919_v59 = vpop.permute.xlu2 %918 }
 0x512   :  { %v921_v15 = vunpack.i.h.bf16 %v919_v59  ;;  %v920_v16 = vunpack.i.l.bf16 %v919_v59 }
 0x53f   :  { %v914_v12 = vpop.permute.xlu1 %913 }
 0x540   :  { %v916_v13 = vunpack.i.h.bf16 %v914_v12  ;;  %v915_v55 = vunpack.i.l.bf16 %v914_v12 }
 0x542   :  { %v548_v57 = vsel %vm157_vm8, %v415_v56, %v916_v13  ;;  %v547_v14 = vsel %vm157_vm8, %v412_v11, %v915_v55  ;;  %v638_v13 = vperm.slane %v1106_v40, 3 }
 0x543   :  { %v549_v20 = vsel %vm294_vm9, %v547_v14, %v920_v16  ;;  %v550_v21 = vsel %vm294_vm9, %v548_v57, %v921_v15  ;;  %v873_v16 = vld [vmem:[%s1312_s5 + $0x18] sm:$0xff] }
 0x54a   :  { %v924_v17 = vpop.permute.xlu0 %923 }
 0x54b   :  { %v926_v18 = vunpack.i.h.bf16 %v924_v17  ;;  %v925_v19 = vunpack.i.l.bf16 %v924_v17  ;;  %v872_v17 = vld [vmem:[%s1312_s5 + $0x10] sm:$0xff] }
 0x54d   :  { %v552_v23 = vsel %vm551_vm10, %v549_v20, %v925_v19  ;;  %v553_v24 = vsel %vm551_vm10, %v550_v21, %v926_v18  ;;  %v871_v18 = vld [vmem:[%s1312_s5 + $0x8] sm:$0xff]  ;;  %v870_v19 = vld [vmem:[%s1312_s5] sm:$0xff]  ;;  %v646_v21 = vperm.slane %v1106_v40, 6 }
 0x54e   :  { %v554_v53 = vpack.c.bf16 %v553_v24, %v552_v23 }
 0x550   :  { %822 = vmatmul.msk.bf16.vlgmr.msra.gmra.mxu1 %vm47_vm0, %v554_v53 }
 0x5cd   :  { %v584_v25 = vpop.f32.mrf.mxu1 }
 0x5ce   :  { %v585_v26 = vadd.f32 %v584_v25, %v559_v54 }
 0x5d0   :  { %v1247_v27 = vadd.f32 %v585_v26, %v1079_v0 }
 0x5d2   :  { %v591_v22 = vsel %vm47_vm0, %v1247_v27, 0.0 }
 0x5d3   :  { %592 = vadd.xlane.f32.xlu1 %v591_v22  ;;  %v695_v22 = vperm.slane %v1106_v40, 5 }
 0x5d5   :  { %v586_v28 = vpop.f32.mrf.mxu1 }
 0x5d6   :  { %v587_v29 = vadd.f32 %v586_v28, %v559_v54 }
 0x5d8   :  { %v1252_v30 = vadd.f32 %v587_v29, %v1086_v2 }
 0x5da   :  { %v594_v31 = vsel %vm47_vm0, %v1252_v30, 0.0 }
 0x5db   :  { %595 = vadd.xlane.f32.xlu2 %v594_v31 }
 0x646   :  { %v593_v32 = vpop.xlane.xlu1 %592 }
 0x647   :  { %v597_v33 = vmul.f32 %v593_v32, %v1090_v10 }
 0x649   :  { %v599_v34 = vsub.f32 %v1247_v27, %v597_v33 }
 0x64b   :  { %v601_v0 = vmul.f32 %v599_v34, %v599_v34 }
 0x64d   :  { %v603_v35 = vsel %vm47_vm0, %v601_v0, 0.0 }
 0x64e   :  { %v596_v36 = vpop.xlane.xlu2 %595  ;;  %604 = vadd.xlane.f32.xlu0 %v603_v35 }
 0x64f   :  { %v598_v37 = vmul.f32 %v596_v36, %v1090_v10 }
 0x651   :  { %v600_v38 = vsub.f32 %v1252_v30, %v598_v37 }
 0x653   :  { %v602_v2 = vmul.f32 %v600_v38, %v600_v38 }
 0x655   :  { %v606_v41 = vsel %vm47_vm0, %v602_v2, 0.0 }
 0x656   :  { %607 = vadd.xlane.f32.xlu1 %v606_v41 }
 0x6c1   :  { %v605_v43 = vpop.xlane.xlu0 %604 }
 0x6c2   :  { %v609_v45 = vmul.f32 %v605_v43, %v1090_v10 }
 0x6c4   :  { %v611_v46 = vadd.f32 1e-05, %v609_v45 }
 0x6c6   :  { %965 = vrsqrt.f32 %v611_v46  ;;  %vm619_vm12 = vweird.f32 %v611_v46 }
 0x6c9   :  { %v608_v48 = vpop.xlane.xlu1 %607 }
 0x6ca   :  { %v610_v49 = vmul.f32 %v608_v48, %v1090_v10  ;;  %v874_v10 = vld [vmem:[%s1312_s5 + $0x20] sm:$0xff]  ;;  %s1031_s5 = smov [#allocation5]  }
 0x6cb   :  { %747 = vmatpush.bf16.msra.mxu3 %v874_v10  ;;  %s766_s18 = sshll.u32 %s1031_s5, 4  ;;  %s767_s18 = int_to_ptr.vmem [resolvable:$true] %s766_s18 }
 0x6cc   :  { %v966_v50 = vpop.eup %965  ;;  %v612_v51 = vadd.f32 1e-05, %v610_v49 }
 0x6cd   :  { %v614_v52 = vmul.f32 %v966_v50, %v611_v46  ;;  %vm620_vm11 = vweird.f32 %v966_v50 }
 0x6ce   :  { %967 = vrsqrt.f32 %v612_v51  ;;  %vm621_vm13 = vmor %vm619_vm12, %vm620_vm11  ;;  %vm629_vm15 = vweird.f32 %v612_v51 }
 0x6cf   :  { %v615_v62 = vmul.f32 %v966_v50, %v614_v52  ;;  %748 = vmatpush.bf16.msra.mxu3 %v873_v16 }
 0x6d1   :  { %v616_v63 = vmul.f32 0.5, %v615_v62 }
 0x6d3   :  { %v617_v1 = vsub.f32 1.5, %v616_v63  ;;  %749 = vmatpush.bf16.msra.mxu3 %v872_v17 }
 0x6d4   :  { %v968_v3 = vpop.eup %967 }
 0x6d5   :  { %v618_v4 = vmul.f32 %v966_v50, %v617_v1  ;;  %v624_v5 = vmul.f32 %v968_v3, %v612_v51  ;;  %vm630_vm14 = vweird.f32 %v968_v3 }
 0x6d6   :  { %vm631_vm1 = vmor %vm629_vm15, %vm630_vm14 }
 0x6d7   :  { %v625_v6 = vmul.f32 %v968_v3, %v624_v5  ;;  %v622_v7 = vsel %vm621_vm13, %v966_v50, %v618_v4  ;;  %750 = vmatpush.bf16.msra.mxu3 %v871_v18 }
 0x6d8   :  { %v633_v9 = vmul.f32 %v622_v7, %v599_v34 }
 0x6d9   :  { %v626_v8 = vmul.f32 0.5, %v625_v6 }
 0x6da   :  { %v636_v55 = vmul.f32 %v635_v60, %v633_v9 }
 0x6db   :  { %v627_v58 = vsub.f32 1.5, %v626_v8  ;;  %751 = vmatpush.bf16.msra.mxu3 %v870_v19 }
 0x6dc   :  { %v639_v57 = vadd.f32 %v638_v13, %v636_v55 }
 0x6dd   :  { %v628_v11 = vmul.f32 %v968_v3, %v627_v58 }
 0x6df   :  { %v632_v12 = vsel %vm631_vm1, %v968_v3, %v628_v11 }
 0x6e0   :  { %v634_v59 = vmul.f32 %v632_v12, %v600_v38 }
 0x6e2   :  { %v637_v56 = vmul.f32 %v635_v60, %v634_v59 }
 0x6e4   :  { %v640_v14 = vadd.f32 %v638_v13, %v637_v56 }
 0x6e6   :  { %v641_v15 = vpack.c.bf16 %v640_v14, %v639_v57 }
 0x6e8   :  { %831 = vmatmul.msk.bf16.vlgmr.msra.gmra.mxu2 %vm47_vm0, %v641_v15 }
 0x76b   :  { %v671_v20 = vpop.f32.mrf.mxu2 }
 0x76c   :  { %v672_v23 = vadd.f32 %v671_v20, %v646_v21 }
 0x76e   :  { %v676_v54 = vmax.f32 %v672_v23, 0.0 }
 0x773   :  { %v673_v24 = vpop.f32.mrf.mxu2 }
 0x774   :  { %v674_v53 = vadd.f32 %v673_v24, %v646_v21 }
 0x776   :  { %v677_v25 = vmax.f32 %v674_v53, 0.0 }
 0x778   :  { %v678_v26 = vpack.c.bf16 %v677_v25, %v676_v54 }
 0x77a   :  { %752 = vmatmul.bf16.vlgmr.msra.gmra.mxu3 %v678_v26 }
 0x7fd   :  { %v753_v28 = vpop.f32.mrf.mxu3 }
 0x7fe   :  { %v754_v29 = vadd.f32 %v753_v28, %v695_v22 }
 0x800   :  { %v758_v31 = vadd.f32 %v754_v29, %v1247_v27 }
 0x802   :  { %760 = vst.msk [vmem:[#allocation5] sm:$0xff] %vm47_vm0, %v758_v31 }
 0x805   :  { %v755_v32 = vpop.f32.mrf.mxu3 }
 0x806   :  { %v756_v33 = vadd.f32 %v755_v32, %v695_v22 }
 0x808   :  { %v759_v34 = vadd.f32 %v756_v33, %v1252_v30 }
 0x80a   :  { %761 = vst.msk [vmem:[#allocation5 + $0x8] sm:$0xff] %vm47_vm0, %v759_v34 }
 0x80b   :  { %774 = dma.vmem_to_hbm [thread:$0]  %s767_s18, 256, %s769_s21, [#allocation4], %s1032_s22, %s1032_s22, %s1029_s20  }
 0x80c   :  { %1019 = dma.done.wait [#allocation4], 256  }
 0x80d   :  { %1020 = vsyncadd [#allocation4], 4294967040 }
 0x80e   :  { %779 = vsyncpa [#allocation3], 1 }
 0x80f   :  { %780 = vsyncpa [#allocation4], 1 }

</bundles_post_ra>
